<compile_context>
chip_gen: v5e
topology: v5e:2x2
jax: 0.10.0
libtpu: 0.0.40
codegen_flags: <defaults>
</compile_context>

<pallas_src>
import jax
import jax.numpy as jnp
from jax.experimental import pallas as pl
from jax.experimental.pallas import tpu as pltpu


# ------------------------------------------------------------------
# Fused model + CFG-combine kernel: `bb` batch elements per grid step.
# ------------------------------------------------------------------
def _cfg_model_kernel(scale_ref, x_ref, bias_ref, w1_ref, w2_ref, b2_ref, o_ref):
    """
    scale_ref: (1, 1)     f32 SMEM  guidance scale s
    x_ref    : (bb, T, D) bf16      noisy motion
    bias_ref : (bb, 2, H) f32       stacked [cond | uncond] first-layer bias
                                    (b1 + t_emb [+ class_emb * class_mask])
    w1_ref   : (D, H) bf16, w2_ref: (H, D) bf16, b2_ref: (1, D) f32  (grid-resident)
    o_ref    : (bb, T, D) f32       s*out_cond + (1-s)*out_uncond
    """
    bb, T, D = x_ref.shape
    H = w1_ref.shape[-1]

    s = scale_ref[0, 0]                    # f32 scalar from SMEM
    one_minus_s = 1.0 - s                  # hoisted once

    # Collapse (bb, T) -> rows: one (bb*T, D) @ (D, H) MXU call (bf16 in, f32 acc).
    x_rows = x_ref[...].reshape(bb * T, D)
    h_pre = jnp.dot(x_rows, w1_ref[...], preferred_element_type=jnp.float32)  # (bb*T, H)
    h_pre = h_pre.reshape(bb, T, H)        # split leading dim back (lane dim unchanged)

    bias = bias_ref[...]                                     # (bb, 2, H) f32
    h_c = jax.nn.gelu(h_pre + bias[:, 0:1, :])               # conditional   (bb, T, H)
    h_u = jax.nn.gelu(h_pre + bias[:, 1:2, :])               # unconditional (bb, T, H)

    # CFG combine BEFORE W2:  s*(A@W2+b2) + (1-s)*(B@W2+b2) == (s*A+(1-s)*B)@W2 + b2.
    h_mix = s * h_c + one_minus_s * h_u                      # f32, VPU

    out = jnp.dot(h_mix.reshape(bb * T, H).astype(w2_ref.dtype), w2_ref[...],
                  preferred_element_type=jnp.float32)        # (bb*T, D) f32
    out = out + b2_ref[...]                                  # + b2 once
    o_ref[...] = out.reshape(bb, T, D).astype(o_ref.dtype)


def cfg_sample_pallas(x, bias_stacked, w1, w2, b2, cfg_scale):
    """Fused CFG sampler.

    x:            (B, T, D) float32
    bias_stacked: (B, 2, H) float32  -- [:,0]=cond bias, [:,1]=uncond bias
    w1: (D, H), w2: (H, D), b2: (D,)
    """
    B, T, D = x.shape
    H = w1.shape[-1]

    # bf16 MXU operands (f32 accumulation happens in-kernel).
    x_bf = x.astype(jnp.bfloat16)
    w1_bf = w1.astype(jnp.bfloat16)
    w2_bf = w2.astype(jnp.bfloat16)
    b2_2 = b2[None, :].astype(jnp.float32)                    # (1, D)
    scale = jnp.full((1, 1), cfg_scale, dtype=jnp.float32)    # SMEM scalars are 32-bit

    # Batch elements per grid step: whole batch in one step at toy sizes; at scale target
    # >= 512 MXU rows (bb*T) per step.  (On v7x, additionally keep >=2 even grid steps so
    # both TensorCores get work.)
    rows_target = 512
    bb = B
    if B * T > rows_target:
        bb = max(1, rows_target // T)
        while B % bb:
            bb -= 1
    grid = (B // bb,)

    return pl.pallas_call(
        _cfg_model_kernel,
        out_shape=jax.ShapeDtypeStruct((B, T, D), jnp.float32),
        grid=grid,
        in_specs=[
            pl.BlockSpec(memory_space=pltpu.MemorySpace.SMEM),    # cfg scale (1,1) f32
            pl.BlockSpec((bb, T, D), lambda i: (i, 0, 0)),        # x (read once)
            pl.BlockSpec((bb, 2, H), lambda i: (i, 0, 0)),        # stacked biases
            pl.BlockSpec((D, H), lambda i: (0, 0)),               # W1 (resident)
            pl.BlockSpec((H, D), lambda i: (0, 0)),               # W2 (resident)
            pl.BlockSpec((1, D), lambda i: (0, 0)),               # b2 (resident)
        ],
        out_specs=pl.BlockSpec((bb, T, D), lambda i: (i, 0, 0)),
        compiler_params=pltpu.CompilerParams(
            dimension_semantics=("parallel",)),
    )(scale, x_bf, bias_stacked.astype(jnp.float32), w1_bf, w2_bf, b2_2)


# ------------------------------------------------------------------
# Glue (plain JAX): embeddings, mirroring the PyTorch forward's conditioning.
# ------------------------------------------------------------------
def sinusoidal_embedding(t, dim):
    assert dim % 2 == 0, "embedding dim must be even"
    half = dim // 2
    freqs = jnp.exp(-jnp.log(10000.0) * jnp.arange(half, dtype=jnp.float32) / half)
    args = t.astype(jnp.float32)[:, None] * freqs[None, :]
    return jnp.concatenate([jnp.sin(args), jnp.cos(args)], axis=-1)


def classifier_free_sample_forward(x, timesteps, class_id, class_mask,
                                   params, class_table, cfg_scale):
    """CFG-sampler semantics of ClassCond_ClassifierFreeSampleModel.forward, with the
    batch duplication + combine fused into a single Pallas kernel."""
    B, T, D = x.shape
    H = class_table.shape[-1]
    w1, b1, w2, b2 = params

    # Embedding lookups stay in plain JAX (data-dependent gather).
    t_emb = sinusoidal_embedding(timesteps, H)                # (B, H)
    c_emb = class_table[class_id]                             # (B, H)

    cm = class_mask.astype(jnp.float32)[:, None]              # (B, 1)
    cond_bias = b1[None, :] + t_emb + c_emb * cm              # conditional half
    uncond_bias = b1[None, :] + t_emb                         # class_mask zeroed
    bias_stacked = jnp.stack([cond_bias, uncond_bias], axis=1)  # (B, 2, H)

    return cfg_sample_pallas(x, bias_stacked, w1, w2, b2, cfg_scale)


# ------------------------------------------------------------------
# Pure-JAX reference: literal duplicated-batch path of the PyTorch module (f32).
# ------------------------------------------------------------------
def _reference_forward(x, timesteps, class_id, class_mask,
                       params, class_table, cfg_scale):
    B, T, D = x.shape
    H = class_table.shape[-1]
    w1, b1, w2, b2 = params

    x2 = jnp.concatenate([x, x], axis=0)
    t2 = jnp.concatenate([timesteps, timesteps], axis=0)
    cid2 = jnp.concatenate([class_id, class_id], axis=0)
    cm2 = jnp.concatenate([class_mask, jnp.zeros_like(class_mask)], axis=0)

    t_emb = sinusoidal_embedding(t2, H)
    c_emb = class_table[cid2]
    cond = (t_emb + c_emb * cm2.astype(x.dtype)[:, None])[:, None, :]     # (2B, 1, H)

    h = jax.nn.gelu(jnp.einsum('btd,dh->bth', x2, w1) + b1[None, None, :] + cond)
    out = jnp.einsum('bth,hd->btd', h, w2) + b2[None, None, :]
    return cfg_scale * out[:B] + (1.0 - cfg_scale) * out[B:]


if __name__ == "__main__":
    B, T, D, H, C = 2, 8, 32, 64, 10
    cfg_scale = 2.5

    key = jax.random.PRNGKey(0)
    k = jax.random.split(key, 8)

    # inputs
    x = jax.random.normal(k[0], (B, T, D), dtype=jnp.float32)
    timesteps = jax.random.randint(k[1], (B,), 0, 1000)
    class_id = jax.random.randint(k[2], (B,), 0, C)
    class_mask = jnp.ones((B,), dtype=jnp.float32)

    # deterministic synthetic model parameters
    w1 = 0.02 * jax.random.normal(k[3], (D, H), dtype=jnp.float32)
    b1 = 0.02 * jax.random.normal(k[4], (H,), dtype=jnp.float32)
    w2 = 0.02 * jax.random.normal(k[5], (H, D), dtype=jnp.float32)
    b2 = 0.02 * jax.random.normal(k[6], (D,), dtype=jnp.float32)
    class_table = 0.02 * jax.random.normal(k[7], (C, H), dtype=jnp.float32)
    params = (w1, b1, w2, b2)

    out = classifier_free_sample_forward(
        x, timesteps, class_id, class_mask, params, class_table, cfg_scale)
    out = jax.block_until_ready(out)

    assert out.shape == (B, T, D), out.shape
    assert out.dtype == jnp.float32

    ref = jax.block_until_ready(_reference_forward(
        x, timesteps, class_id, class_mask, params, class_table, cfg_scale))
    # bf16 MXU operands vs. f32 reference -> loosened tolerance (per review).
    assert jnp.allclose(out, ref, rtol=2e-2, atol=2e-2), \
        float(jnp.max(jnp.abs(out - ref)))

    print("KERNEL_OK")
</pallas_src>

<mosaic_0001>
module attributes {stable_mosaic.version = 11 : i64} {
  func.func @_cfg_model_kernel(%arg0: i32, %arg1: memref<1x1xf32, #tpu.memory_space<smem>>, %arg2: memref<2x8x32xbf16, #tpu.memory_space<vmem>>, %arg3: memref<2x2x64xf32, #tpu.memory_space<vmem>>, %arg4: memref<32x64xbf16, #tpu.memory_space<vmem>>, %arg5: memref<64x32xbf16, #tpu.memory_space<vmem>>, %arg6: memref<1x32xf32, #tpu.memory_space<vmem>>, %arg7: memref<2x8x32xf32, #tpu.memory_space<vmem>>) attributes {dimension_semantics = [#tpu.dimension_semantics<parallel>], iteration_bounds = array<i64: 1>, scalar_prefetch = 0 : i64, scratch_operands = 0 : i64, tpu.core_type = #tpu.core_type<tc>, window_params = [{transform_indices = @transform_0, window_bounds = array<i64: 1, 1>}, {transform_indices = @transform_1, window_bounds = array<i64: 2, 8, 32>}, {transform_indices = @transform_2, window_bounds = array<i64: 2, 2, 64>}, {pipeline_mode = #tpu.pipeline_mode<synchronous>, transform_indices = @transform_3, window_bounds = array<i64: 32, 64>}, {pipeline_mode = #tpu.pipeline_mode<synchronous>, transform_indices = @transform_4, window_bounds = array<i64: 64, 32>}, {pipeline_mode = #tpu.pipeline_mode<synchronous>, transform_indices = @transform_5, window_bounds = array<i64: 1, 32>}, {transform_indices = @transform_6, window_bounds = array<i64: 2, 8, 32>}]} {
    %c0 = arith.constant 0 : index
    %c0_0 = arith.constant 0 : index
    %0 = memref.load %arg1[%c0, %c0_0] : memref<1x1xf32, #tpu.memory_space<smem>>
    %cst = arith.constant 1.000000e+00 : f32
    %1 = arith.subf %cst, %0 : f32
    %c0_1 = arith.constant 0 : index
    %c0_2 = arith.constant 0 : index
    %c0_3 = arith.constant 0 : index
    %2 = vector.load %arg2[%c0_1, %c0_2, %c0_3] : memref<2x8x32xbf16, #tpu.memory_space<vmem>>, vector<2x8x32xbf16>
    %3 = vector.shape_cast %2 : vector<2x8x32xbf16> to vector<16x32xbf16>
    %c0_4 = arith.constant 0 : index
    %c0_5 = arith.constant 0 : index
    %4 = vector.load %arg4[%c0_4, %c0_5] : memref<32x64xbf16, #tpu.memory_space<vmem>>, vector<32x64xbf16>
    %cst_6 = arith.constant dense<0.000000e+00> : vector<16x64xf32>
    %5 = tpu.matmul %3, %4, %cst_6 {dimension_numbers = #tpu.dot_dimension_numbers<[1], [0], [0], [1], [0, 0, 1, 1], [], []>} : vector<16x32xbf16>, vector<32x64xbf16>, vector<16x64xf32> -> vector<16x64xf32>
    %6 = vector.shape_cast %5 : vector<16x64xf32> to vector<2x8x64xf32>
    %c0_7 = arith.constant 0 : index
    %c0_8 = arith.constant 0 : index
    %c0_9 = arith.constant 0 : index
    %7 = vector.load %arg3[%c0_7, %c0_8, %c0_9] : memref<2x2x64xf32, #tpu.memory_space<vmem>>, vector<2x2x64xf32>
    %8 = vector.extract_strided_slice %7 {offsets = [0, 0, 0], sizes = [2, 1, 64], strides = [1, 1, 1]} : vector<2x2x64xf32> to vector<2x1x64xf32>
    %9 = vector.broadcast %8 : vector<2x1x64xf32> to vector<2x8x64xf32>
    %10 = arith.addf %6, %9 : vector<2x8x64xf32>
    %11 = arith.mulf %10, %10 : vector<2x8x64xf32>
    %12 = arith.mulf %10, %11 : vector<2x8x64xf32>
    %cst_10 = arith.constant 4.471500e-02 : f32
    %13 = vector.broadcast %cst_10 : f32 to vector<2x8x64xf32>
    %14 = arith.mulf %13, %12 : vector<2x8x64xf32>
    %15 = arith.addf %10, %14 : vector<2x8x64xf32>
    %cst_11 = arith.constant 0.797884583 : f32
    %16 = vector.broadcast %cst_11 : f32 to vector<2x8x64xf32>
    %17 = arith.mulf %16, %15 : vector<2x8x64xf32>
    %18 = math.tanh %17 : vector<2x8x64xf32>
    %cst_12 = arith.constant 1.000000e+00 : f32
    %19 = vector.broadcast %cst_12 : f32 to vector<2x8x64xf32>
    %20 = arith.addf %19, %18 : vector<2x8x64xf32>
    %cst_13 = arith.constant 5.000000e-01 : f32
    %21 = vector.broadcast %cst_13 : f32 to vector<2x8x64xf32>
    %22 = arith.mulf %21, %20 : vector<2x8x64xf32>
    %23 = arith.mulf %10, %22 : vector<2x8x64xf32>
    %24 = vector.extract_strided_slice %7 {offsets = [0, 1, 0], sizes = [2, 1, 64], strides = [1, 1, 1]} : vector<2x2x64xf32> to vector<2x1x64xf32>
    %25 = vector.broadcast %24 : vector<2x1x64xf32> to vector<2x8x64xf32>
    %26 = arith.addf %6, %25 : vector<2x8x64xf32>
    %27 = arith.mulf %26, %26 : vector<2x8x64xf32>
    %28 = arith.mulf %26, %27 : vector<2x8x64xf32>
    %cst_14 = arith.constant 4.471500e-02 : f32
    %29 = vector.broadcast %cst_14 : f32 to vector<2x8x64xf32>
    %30 = arith.mulf %29, %28 : vector<2x8x64xf32>
    %31 = arith.addf %26, %30 : vector<2x8x64xf32>
    %cst_15 = arith.constant 0.797884583 : f32
    %32 = vector.broadcast %cst_15 : f32 to vector<2x8x64xf32>
    %33 = arith.mulf %32, %31 : vector<2x8x64xf32>
    %34 = math.tanh %33 : vector<2x8x64xf32>
    %cst_16 = arith.constant 1.000000e+00 : f32
    %35 = vector.broadcast %cst_16 : f32 to vector<2x8x64xf32>
    %36 = arith.addf %35, %34 : vector<2x8x64xf32>
    %cst_17 = arith.constant 5.000000e-01 : f32
    %37 = vector.broadcast %cst_17 : f32 to vector<2x8x64xf32>
    %38 = arith.mulf %37, %36 : vector<2x8x64xf32>
    %39 = arith.mulf %26, %38 : vector<2x8x64xf32>
    %40 = vector.broadcast %0 : f32 to vector<2x8x64xf32>
    %41 = arith.mulf %40, %23 : vector<2x8x64xf32>
    %42 = vector.broadcast %1 : f32 to vector<2x8x64xf32>
    %43 = arith.mulf %42, %39 : vector<2x8x64xf32>
    %44 = arith.addf %41, %43 : vector<2x8x64xf32>
    %45 = vector.shape_cast %44 : vector<2x8x64xf32> to vector<16x64xf32>
    %46 = arith.truncf %45 : vector<16x64xf32> to vector<16x64xbf16>
    %c0_18 = arith.constant 0 : index
    %c0_19 = arith.constant 0 : index
    %47 = vector.load %arg5[%c0_18, %c0_19] : memref<64x32xbf16, #tpu.memory_space<vmem>>, vector<64x32xbf16>
    %cst_20 = arith.constant dense<0.000000e+00> : vector<16x32xf32>
    %48 = tpu.matmul %46, %47, %cst_20 {dimension_numbers = #tpu.dot_dimension_numbers<[1], [0], [0], [1], [0, 0, 1, 1], [], []>} : vector<16x64xbf16>, vector<64x32xbf16>, vector<16x32xf32> -> vector<16x32xf32>
    %c0_21 = arith.constant 0 : index
    %c0_22 = arith.constant 0 : index
    %49 = vector.load %arg6[%c0_21, %c0_22] : memref<1x32xf32, #tpu.memory_space<vmem>>, vector<1x32xf32>
    %50 = vector.broadcast %49 : vector<1x32xf32> to vector<16x32xf32>
    %51 = arith.addf %48, %50 : vector<16x32xf32>
    %52 = vector.shape_cast %51 : vector<16x32xf32> to vector<2x8x32xf32>
    %c0_23 = arith.constant 0 : index
    %c0_24 = arith.constant 0 : index
    %c0_25 = arith.constant 0 : index
    %53 = vector.load %arg7[%c0_23, %c0_24, %c0_25] : memref<2x8x32xf32, #tpu.memory_space<vmem>>, vector<2x8x32xf32>
    tpu.vector_store %arg7[%c0_23, %c0_24, %c0_25], %52 {strides = array<i32>} : memref<2x8x32xf32, #tpu.memory_space<vmem>>, vector<2x8x32xf32>,
    return
  }
  func.func @transform_0(%arg0: i32) -> (i32, i32) {
    %c0_i32 = arith.constant 0 : i32
    %c0_i32_0 = arith.constant 0 : i32
    %c0_i32_1 = arith.constant 0 : i32
    return %c0_i32, %c0_i32_0 : i32, i32
  }
  func.func @transform_1(%arg0: i32) -> (i32, i32, i32) {
    %c0_i32 = arith.constant 0 : i32
    %c0_i32_0 = arith.constant 0 : i32
    %c0_i32_1 = arith.constant 0 : i32
    return %arg0, %c0_i32, %c0_i32_0 : i32, i32, i32
  }
  func.func @transform_2(%arg0: i32) -> (i32, i32, i32) {
    %c0_i32 = arith.constant 0 : i32
    %c0_i32_0 = arith.constant 0 : i32
    %c0_i32_1 = arith.constant 0 : i32
    return %arg0, %c0_i32, %c0_i32_0 : i32, i32, i32
  }
  func.func @transform_3(%arg0: i32) -> (i32, i32) {
    %c0_i32 = arith.constant 0 : i32
    %c0_i32_0 = arith.constant 0 : i32
    %c0_i32_1 = arith.constant 0 : i32
    return %c0_i32, %c0_i32_0 : i32, i32
  }
  func.func @transform_4(%arg0: i32) -> (i32, i32) {
    %c0_i32 = arith.constant 0 : i32
    %c0_i32_0 = arith.constant 0 : i32
    %c0_i32_1 = arith.constant 0 : i32
    return %c0_i32, %c0_i32_0 : i32, i32
  }
  func.func @transform_5(%arg0: i32) -> (i32, i32) {
    %c0_i32 = arith.constant 0 : i32
    %c0_i32_0 = arith.constant 0 : i32
    %c0_i32_1 = arith.constant 0 : i32
    return %c0_i32, %c0_i32_0 : i32, i32
  }
  func.func @transform_6(%arg0: i32) -> (i32, i32, i32) {
    %c0_i32 = arith.constant 0 : i32
    %c0_i32_0 = arith.constant 0 : i32
    %c0_i32_1 = arith.constant 0 : i32
    return %arg0, %c0_i32, %c0_i32_0 : i32, i32, i32
  }
}

</mosaic_0001>

<bundles_post_ra>
// kernel: tpu_custom_call.1
= control target key start
LH: loop header
LB: loop body
LE: loop exit
PB: predicated region body
PF: predicated region fallthrough
CT: control target
= control target key end

     0   :  { %s353_s0 = inlined_call_operand.<no memory space> [shape: f32[1,1], index: 0, kind: input, shape index: {}]   ;;  %s354_s1 = inlined_call_operand.vmem [shape: bf16[2,8,32], index: 1, kind: input, shape index: {}]   ;;  %s355_s2 = inlined_call_operand.vmem [shape: f32[2,2,64], index: 2, kind: input, shape index: {}]   ;;  %s356_s3 = inlined_call_operand.vmem [shape: bf16[32,64], index: 3, kind: input, shape index: {}]   ;;  %s357_s4 = inlined_call_operand.vmem [shape: bf16[64,32], index: 4, kind: input, shape index: {}]   ;;  %s358_s5 = inlined_call_operand.vmem [shape: f32[1,32], index: 5, kind: input, shape index: {}]   ;;  %s359_s6 = inlined_call_operand.hbm [shape: f32[2,8,32], index: 6, kind: output, shape index: {}]  }
   0x1   :  { %v230_v0 = vld [vmem:[%s356_s3 + $0x8] sm:$0xff] }
   0x2   :  { %12 = vsyncpa [#allocation4], 0  ;;  %61 = vmatpush.bf16.msra.mxu0 %v230_v0  ;;  %v229_v1 = vld [vmem:[%s356_s3] sm:$0xff]  ;;  %vm51_vm0 = vcmask 261120   ;;  %v234_v3 = vld [vmem:[%s357_s4 + $0x18] sm:$0xff]  ;;  %s27_s13 = ssub.f32 1.0, %s353_s0  ;;  %v115_v52 = vstv %s353_s0 }
   0x3   :  { %v228_v2 = vld [vmem:[%s354_s1] sm:$0xff]  ;;  %168 = vmatpush.bf16.msra.mxu1 %v234_v3  ;;  %v233_v5 = vld [vmem:[%s357_s4 + $0x10] sm:$0xff]  ;;  %v232_v9 = vld [vmem:[%s357_s4 + $0x8] sm:$0xff]  ;;  %vm160_vm1 = vcmask 523264   ;;  %s273_s0 = smov [#allocation3]   ;;  %s186_s21 = sshll.u32 %s359_s6, 4  ;;  %s187_s21 = int_to_ptr.hbm [resolvable:$true] %s186_s21 }
   0x4   :  { %v69_v4 = vld [vmem:[%s355_s2] sm:$0x3]  ;;  %v70_v12 = vld [vmem:[%s355_s2 + $0x2] sm:$0x3]  ;;  %v118_v53 = vstv %s27_s13  ;;  %s184_s18 = sshll.u32 %s273_s0, 4  ;;  %s274_s22 = smov 128   ;;  %s185_s18 = int_to_ptr.vmem [resolvable:$true] %s184_s18 }
   0x5   :  { %v71_v6 = vperm.slane %v69_v4, 0  ;;  %v93_v7 = vperm.slane %v69_v4, 1  ;;  %v231_v13 = vld [vmem:[%s357_s4] sm:$0xff]  ;;  %v72_v18 = vperm.slane %v70_v12, 0  ;;  %v94_v19 = vperm.slane %v70_v12, 1  ;;  %s275_s23 = smov 8  }
   0x6   :  { %62 = vmatpush.bf16.msra.mxu0 %v229_v1  ;;  %v238_v0 = vld [vmem:[%s358_s5] ss:$0 sm:$0xff] }
   0x7   :  { %169 = vmatpush.bf16.msra.mxu1 %v233_v5 }
   0x9   :  { %210 = vmatmul.msk.bf16.vlgmr.msra.gmra.mxu0 %vm51_vm0, %v228_v2 }
   0xb   :  { %170 = vmatpush.bf16.msra.mxu1 %v232_v9 }
   0xf   :  { %171 = vmatpush.bf16.msra.mxu1 %v231_v13 }
  0x86   :  { %v64_v8 = vpop.f32.mrf.mxu0 }
  0x87   :  { %v73_v10 = vadd.f32 %v71_v6, %v64_v8  ;;  %v95_v11 = vadd.f32 %v93_v7, %v64_v8 }
  0x89   :  { %v75_v14 = vmul.f32 %v73_v10, %v73_v10  ;;  %v97_v15 = vmul.f32 %v95_v11, %v95_v11 }
  0x8b   :  { %v77_v16 = vmul.f32 %v75_v14, %v73_v10  ;;  %v99_v17 = vmul.f32 %v97_v15, %v95_v11 }
  0x8d   :  { %v79_v20 = vmul.f32 0.044715, %v77_v16  ;;  %v101_v21 = vmul.f32 0.044715, %v99_v17 }
  0x8e   :  { %v66_v22 = vpop.f32.mrf.mxu0 }
  0x8f   :  { %v81_v23 = vadd.f32 %v79_v20, %v73_v10  ;;  %v103_v24 = vadd.f32 %v101_v21, %v95_v11  ;;  %v74_v25 = vadd.f32 %v72_v18, %v66_v22  ;;  %v96_v26 = vadd.f32 %v94_v19, %v66_v22 }
  0x91   :  { %v83_v27 = vmul.f32 0.7978846, %v81_v23  ;;  %v105_v28 = vmul.f32 0.7978846, %v103_v24  ;;  %v76_v29 = vmul.f32 %v74_v25, %v74_v25  ;;  %v98_v30 = vmul.f32 %v96_v26, %v96_v26 }
  0x93   :  { %239 = vtanh.f32 %v83_v27  ;;  %v78_v31 = vmul.f32 %v76_v29, %v74_v25  ;;  %v100_v32 = vmul.f32 %v98_v30, %v96_v26 }
  0x94   :  { %241 = vtanh.f32 %v105_v28 }
  0x95   :  { %v80_v33 = vmul.f32 0.044715, %v78_v31  ;;  %v102_v34 = vmul.f32 0.044715, %v100_v32 }
  0x97   :  { %v82_v35 = vadd.f32 %v80_v33, %v74_v25  ;;  %v104_v36 = vadd.f32 %v102_v34, %v96_v26 }
  0x99   :  { %v240_v37 = vpop.eup %239  ;;  %v84_v38 = vmul.f32 0.7978846, %v82_v35  ;;  %v106_v39 = vmul.f32 0.7978846, %v104_v36 }
  0x9a   :  { %v242_v40 = vpop.eup %241  ;;  %v87_v41 = vadd.f32 1.0, %v240_v37 }
  0x9b   :  { %v109_v42 = vadd.f32 1.0, %v242_v40  ;;  %243 = vtanh.f32 %v84_v38 }
  0x9c   :  { %245 = vtanh.f32 %v106_v39  ;;  %v89_v43 = vmul.f32 0.5, %v87_v41 }
  0x9d   :  { %v111_v44 = vmul.f32 0.5, %v109_v42 }
  0x9e   :  { %v91_v48 = vmul.f32 %v89_v43, %v73_v10 }
  0x9f   :  { %v113_v49 = vmul.f32 %v111_v44, %v95_v11 }
  0xa0   :  { %v116_v57 = vmul.f32 %v115_v52, %v91_v48 }
  0xa1   :  { %v244_v45 = vpop.eup %243  ;;  %v119_v58 = vmul.f32 %v118_v53, %v113_v49 }
  0xa2   :  { %v246_v46 = vpop.eup %245  ;;  %v88_v47 = vadd.f32 1.0, %v244_v45 }
  0xa3   :  { %v110_v50 = vadd.f32 1.0, %v246_v46  ;;  %v121_v61 = vadd.f32 %v119_v58, %v116_v57 }
  0xa4   :  { %v90_v51 = vmul.f32 0.5, %v88_v47 }
  0xa5   :  { %v112_v54 = vmul.f32 0.5, %v110_v50 }
  0xa6   :  { %v92_v55 = vmul.f32 %v90_v51, %v74_v25 }
  0xa7   :  { %v114_v56 = vmul.f32 %v112_v54, %v96_v26 }
  0xa8   :  { %v117_v59 = vmul.f32 %v115_v52, %v92_v55 }
  0xa9   :  { %v120_v60 = vmul.f32 %v118_v53, %v114_v56 }
  0xab   :  { %v122_v62 = vadd.f32 %v120_v60, %v117_v59 }
  0xad   :  { %v123_v63 = vpack.c.bf16 %v122_v62, %v121_v61 }
  0xaf   :  { %227 = vmatmul.msk.bf16.vlgmr.msra.gmra.mxu1 %vm160_vm1, %v123_v63 }
 0x12c   :  { %v173_v1 = vpop.f32.mrf.mxu1 }
 0x12d   :  { %v174_v2 = vadd.f32 %v238_v0, %v173_v1 }
 0x12f   :  { %178 = vst.msk [vmem:[#allocation3] sm:$0xff] %vm51_vm0, %v174_v2 }
 0x134   :  { %v175_v3 = vpop.f32.mrf.mxu1 }
 0x135   :  { %v176_v4 = vadd.f32 %v238_v0, %v175_v3 }
 0x137   :  { %179 = vst.msk [vmem:[#allocation3 + $0x8] sm:$0xff] %vm51_vm0, %v176_v4 }
 0x138   :  { %192 = dma.vmem_to_hbm [thread:$0]  %s185_s18, 256, %s187_s21, [#allocation4], %s274_s22, %s274_s22, %s275_s23  }
 0x139   :  { %271 = dma.done.wait [#allocation4], 256  }
 0x13a   :  { %272 = vsyncadd [#allocation4], 4294967040 }
 0x13b   :  { %197 = vsyncpa [#allocation4], 1 }

</bundles_post_ra>
